<compile_context>
chip_gen: v7x
topology: tpu7x:2x2x1
jax: 0.10.0
libtpu: 0.0.40
codegen_flags: <defaults>
</compile_context>

<pallas_src>
import jax
import jax.numpy as jnp
from jax.experimental import pallas as pl
from jax.experimental.pallas import tpu as pltpu

INPUT_SIZE = 64   # small stand-in for the default 512
BATCH = 24        # exercises padding (-> 32) and a 2-step grid
H1 = 128
H2 = 16
OUT = 2
LANE = 128


def _round_up(n, m):
    return ((n + m - 1) // m) * m


def matchnet_kernel(s_ref, w1_ref, b1_ref, w2_ref, b2_ref, w3_ref, b3_ref,
                    o_ref):
    tb = o_ref.shape[0]          # rows per view in this tile (static)
    n1 = b1_ref.shape[1]         # H1 padded to a lane multiple (128)
    no = o_ref.shape[1]          # OUT padded to 128 lanes

    s = s_ref[...]               # (2*tb, D): rows [:tb] = xa, rows [tb:] = xb

    # ---- Layer 1: one dot against packed [W1a | W1b]; rebuild both views ----
    r = jnp.dot(s, w1_ref[...], preferred_element_type=jnp.float32)  # (2tb,2n1)
    ra = r[:, :n1]               # {xa, xb} @ W1[:D]
    rb = r[:, n1:]               # {xa, xb} @ W1[D:]
    h = jnp.concatenate(
        [ra[:tb] + rb[tb:],      # view 1 = xa @ W1a + xb @ W1b
         ra[tb:] + rb[:tb]],     # view 2 = xb @ W1a + xa @ W1b
        axis=0) + b1_ref[...]
    h = jnp.maximum(h, 0.0)      # (2*tb, 128); Dropout == identity in eval

    # ---- Layer 2 (+ ReLU); H2 zero-padded to 128 lanes -> full vregs ----
    h = jnp.dot(h, w2_ref[...], preferred_element_type=jnp.float32) + b2_ref[...]
    h = jnp.maximum(h, 0.0)      # (2*tb, 128)

    # ---- Layer 3: single dot against packed [W3 | W3_swapped] ----
    # out = h1 @ W3 + h2 @ W3[:, ::-1] + (b3 + b3[:, ::-1]), lane-dense store.
    r3 = jnp.dot(h, w3_ref[...], preferred_element_type=jnp.float32)  # (2tb,2no)
    o_ref[...] = (r3[:tb, :no] + r3[tb:, no:] + b3_ref[...]).astype(o_ref.dtype)


def matchnet_pallas(x, params, *, max_tile_b=512):
    """x: (B, 2, D) float32 -> (B, 2) float32 (MatchNet forward, eval mode)."""
    w1, b1, w2, b2, w3, b3 = params
    B, two, D = x.shape
    assert two == 2
    assert w1.shape[0] == 2 * D
    h1 = w1.shape[1]
    h2 = w2.shape[1]
    out_dim = w3.shape[1]
    # The folded logit swap (w3[:, ::-1]) is only "the swap" because OUT == 2.
    assert out_dim == 2, "output-swap fold assumes exactly 2 logits"

    # ---- parameter prep (pure layout plumbing, once, outside the kernel) ----
    h1p = _round_up(h1, LANE)
    h2p = _round_up(h2, LANE)
    outp = LANE

    w1p = jnp.pad(w1, ((0, 0), (0, h1p - h1)))
    b1p = jnp.pad(b1, ((0, 0), (0, h1p - h1)))                   # (1, 128)
    # Split W1 row-wise so the kernel consumes row-stacked [xa; xb] blocks.
    w1pack = jnp.concatenate([w1p[:D], w1p[D:]], axis=1)         # (D, 256)

    w2p = jnp.pad(w2, ((0, h1p - h1), (0, h2p - h2)))            # (128, 128)
    b2p = jnp.pad(b2, ((0, 0), (0, h2p - h2)))                   # (1, 128)

    w3r = jnp.pad(w3, ((0, h2p - h2), (0, 0)))                   # (128, 2)
    w3a = jnp.pad(w3r, ((0, 0), (0, outp - out_dim)))            # (128, 128)
    w3b = jnp.pad(w3r[:, ::-1], ((0, 0), (0, outp - out_dim)))   # swapped cols
    w3pack = jnp.concatenate([w3a, w3b], axis=1)                 # (128, 256)
    b3pack = jnp.pad(b3 + b3[:, ::-1], ((0, 0), (0, outp - out_dim)))  # (1,128)

    # ---- batch tiling ----
    # Aim for >= 2 grid steps once the batch can be split (v7x: 2 TensorCores
    # share "parallel" grid axes); cap tiles at max_tile_b rows per view.
    tile_b = min(max_tile_b, _round_up(max((B + 1) // 2, 1), 8))
    bp = _round_up(B, tile_b)
    nt = bp // tile_b

    xp = x if bp == B else jnp.pad(x, ((0, bp - B), (0, 0), (0, 0)))
    # Per-tile row-stacked views [xa_tile; xb_tile]: a single 1x transpose
    # pass in XLA; no duplicated 2x slab is materialized or re-read.
    s = (xp.reshape(nt, tile_b, 2, D)
           .transpose(0, 2, 1, 3)
           .reshape(nt * 2 * tile_b, D))

    out = pl.pallas_call(
        matchnet_kernel,
        out_shape=jax.ShapeDtypeStruct((bp, outp), jnp.float32),
        grid=(nt,),
        in_specs=[
            pl.BlockSpec((2 * tile_b, D), lambda i: (i, 0)),
            pl.BlockSpec(w1pack.shape, lambda i: (0, 0)),
            pl.BlockSpec(b1p.shape, lambda i: (0, 0)),
            pl.BlockSpec(w2p.shape, lambda i: (0, 0)),
            pl.BlockSpec(b2p.shape, lambda i: (0, 0)),
            pl.BlockSpec(w3pack.shape, lambda i: (0, 0)),
            pl.BlockSpec(b3pack.shape, lambda i: (0, 0)),
        ],
        out_specs=pl.BlockSpec((tile_b, outp), lambda i: (i, 0)),
        compiler_params=pltpu.CompilerParams(
            dimension_semantics=("parallel",)),
    )(s, w1pack, b1p, w2p, b2p, w3pack, b3pack)

    return out[:B, :out_dim]


def init_params(key, input_size):
    """Deterministic PyTorch-Linear-style init; weights stored as (in, out)."""
    dims = [(2 * input_size, H1), (H1, H2), (H2, OUT)]
    params = []
    for fan_in, fan_out in dims:
        kw, kb, key = jax.random.split(key, 3)
        bound = 1.0 / jnp.sqrt(fan_in)
        w = jax.random.uniform(kw, (fan_in, fan_out), jnp.float32, -bound, bound)
        b = jax.random.uniform(kb, (1, fan_out), jnp.float32, -bound, bound)
        params += [w, b]
    return tuple(params)


def matchnet_reference(x, params):
    w1, b1, w2, b2, w3, b3 = params
    xa, xb = x[:, 0, :], x[:, 1, :]
    x1 = jnp.concatenate([xa, xb], axis=-1)
    x2 = jnp.concatenate([xb, xa], axis=-1)

    def mlp(h):
        h = jnp.maximum(h @ w1 + b1, 0.0)
        h = jnp.maximum(h @ w2 + b2, 0.0)
        return h @ w3 + b3

    y1, y2 = mlp(x1), mlp(x2)
    return y1 + jnp.concatenate([y2[:, 1:2], y2[:, 0:1]], axis=1)


if __name__ == "__main__":
    key = jax.random.PRNGKey(0)
    kx, kp = jax.random.split(key)
    x = jax.random.normal(kx, (BATCH, 2, INPUT_SIZE), jnp.float32)
    params = init_params(kp, INPUT_SIZE)

    out = jax.block_until_ready(matchnet_pallas(x, params))

    ref = matchnet_reference(x, params)
    assert out.shape == (BATCH, OUT)
    assert jnp.allclose(out, ref, atol=1e-4, rtol=1e-4), "mismatch vs reference"

    print("KERNEL_OK")
</pallas_src>

<mosaic_0001>
module attributes {stable_mosaic.version = 11 : i64} {
  func.func @matchnet_kernel(%arg0: i32, %arg1: memref<32x64xf32, #tpu.memory_space<vmem>>, %arg2: memref<64x256xf32, #tpu.memory_space<vmem>>, %arg3: memref<1x128xf32, #tpu.memory_space<vmem>>, %arg4: memref<128x128xf32, #tpu.memory_space<vmem>>, %arg5: memref<1x128xf32, #tpu.memory_space<vmem>>, %arg6: memref<128x256xf32, #tpu.memory_space<vmem>>, %arg7: memref<1x128xf32, #tpu.memory_space<vmem>>, %arg8: memref<16x128xf32, #tpu.memory_space<vmem>>) attributes {dimension_semantics = [#tpu.dimension_semantics<parallel>], iteration_bounds = array<i64: 2>, scalar_prefetch = 0 : i64, scratch_operands = 0 : i64, tpu.core_type = #tpu.core_type<tc>, window_params = [{transform_indices = @transform_0, window_bounds = array<i64: 32, 64>}, {pipeline_mode = #tpu.pipeline_mode<synchronous>, transform_indices = @transform_1, window_bounds = array<i64: 64, 256>}, {pipeline_mode = #tpu.pipeline_mode<synchronous>, transform_indices = @transform_2, window_bounds = array<i64: 1, 128>}, {pipeline_mode = #tpu.pipeline_mode<synchronous>, transform_indices = @transform_3, window_bounds = array<i64: 128, 128>}, {pipeline_mode = #tpu.pipeline_mode<synchronous>, transform_indices = @transform_4, window_bounds = array<i64: 1, 128>}, {pipeline_mode = #tpu.pipeline_mode<synchronous>, transform_indices = @transform_5, window_bounds = array<i64: 128, 256>}, {pipeline_mode = #tpu.pipeline_mode<synchronous>, transform_indices = @transform_6, window_bounds = array<i64: 1, 128>}, {transform_indices = @transform_7, window_bounds = array<i64: 16, 128>}]} {
    %c0 = arith.constant 0 : index
    %c0_0 = arith.constant 0 : index
    %0 = vector.load %arg1[%c0, %c0_0] : memref<32x64xf32, #tpu.memory_space<vmem>>, vector<32x64xf32>
    %c0_1 = arith.constant 0 : index
    %c0_2 = arith.constant 0 : index
    %1 = vector.load %arg2[%c0_1, %c0_2] : memref<64x256xf32, #tpu.memory_space<vmem>>, vector<64x256xf32>
    %cst = arith.constant dense<0.000000e+00> : vector<32x256xf32>
    %2 = tpu.matmul %0, %1, %cst {dimension_numbers = #tpu.dot_dimension_numbers<[1], [0], [0], [1], [0, 0, 1, 1], [], []>} : vector<32x64xf32>, vector<64x256xf32>, vector<32x256xf32> -> vector<32x256xf32>
    %3 = vector.extract_strided_slice %2 {offsets = [0, 0], sizes = [32, 128], strides = [1, 1]} : vector<32x256xf32> to vector<32x128xf32>
    %4 = vector.extract_strided_slice %2 {offsets = [0, 128], sizes = [32, 128], strides = [1, 1]} : vector<32x256xf32> to vector<32x128xf32>
    %5 = vector.extract_strided_slice %3 {offsets = [0, 0], sizes = [16, 128], strides = [1, 1]} : vector<32x128xf32> to vector<16x128xf32>
    %6 = vector.extract_strided_slice %4 {offsets = [16, 0], sizes = [16, 128], strides = [1, 1]} : vector<32x128xf32> to vector<16x128xf32>
    %7 = arith.addf %5, %6 : vector<16x128xf32>
    %8 = vector.extract_strided_slice %3 {offsets = [16, 0], sizes = [16, 128], strides = [1, 1]} : vector<32x128xf32> to vector<16x128xf32>
    %9 = vector.extract_strided_slice %4 {offsets = [0, 0], sizes = [16, 128], strides = [1, 1]} : vector<32x128xf32> to vector<16x128xf32>
    %10 = arith.addf %8, %9 : vector<16x128xf32>
    %11 = tpu.concatenate %7, %10 in 0 : vector<16x128xf32>, vector<16x128xf32> -> vector<32x128xf32>
    %c0_3 = arith.constant 0 : index
    %c0_4 = arith.constant 0 : index
    %12 = vector.load %arg3[%c0_3, %c0_4] : memref<1x128xf32, #tpu.memory_space<vmem>>, vector<1x128xf32>
    %13 = vector.broadcast %12 : vector<1x128xf32> to vector<32x128xf32>
    %14 = arith.addf %11, %13 : vector<32x128xf32>
    %cst_5 = arith.constant 0.000000e+00 : f32
    %15 = vector.broadcast %cst_5 : f32 to vector<32x128xf32>
    %16 = arith.maximumf %14, %15 : vector<32x128xf32>
    %c0_6 = arith.constant 0 : index
    %c0_7 = arith.constant 0 : index
    %17 = vector.load %arg4[%c0_6, %c0_7] : memref<128x128xf32, #tpu.memory_space<vmem>>, vector<128x128xf32>
    %cst_8 = arith.constant dense<0.000000e+00> : vector<32x128xf32>
    %18 = tpu.matmul %16, %17, %cst_8 {dimension_numbers = #tpu.dot_dimension_numbers<[1], [0], [0], [1], [0, 0, 1, 1], [], []>} : vector<32x128xf32>, vector<128x128xf32>, vector<32x128xf32> -> vector<32x128xf32>
    %c0_9 = arith.constant 0 : index
    %c0_10 = arith.constant 0 : index
    %19 = vector.load %arg5[%c0_9, %c0_10] : memref<1x128xf32, #tpu.memory_space<vmem>>, vector<1x128xf32>
    %20 = vector.broadcast %19 : vector<1x128xf32> to vector<32x128xf32>
    %21 = arith.addf %18, %20 : vector<32x128xf32>
    %cst_11 = arith.constant 0.000000e+00 : f32
    %22 = vector.broadcast %cst_11 : f32 to vector<32x128xf32>
    %23 = arith.maximumf %21, %22 : vector<32x128xf32>
    %c0_12 = arith.constant 0 : index
    %c0_13 = arith.constant 0 : index
    %24 = vector.load %arg6[%c0_12, %c0_13] : memref<128x256xf32, #tpu.memory_space<vmem>>, vector<128x256xf32>
    %cst_14 = arith.constant dense<0.000000e+00> : vector<32x256xf32>
    %25 = tpu.matmul %23, %24, %cst_14 {dimension_numbers = #tpu.dot_dimension_numbers<[1], [0], [0], [1], [0, 0, 1, 1], [], []>} : vector<32x128xf32>, vector<128x256xf32>, vector<32x256xf32> -> vector<32x256xf32>
    %26 = vector.extract_strided_slice %25 {offsets = [0, 0], sizes = [16, 128], strides = [1, 1]} : vector<32x256xf32> to vector<16x128xf32>
    %27 = vector.extract_strided_slice %25 {offsets = [16, 128], sizes = [16, 128], strides = [1, 1]} : vector<32x256xf32> to vector<16x128xf32>
    %28 = arith.addf %26, %27 : vector<16x128xf32>
    %c0_15 = arith.constant 0 : index
    %c0_16 = arith.constant 0 : index
    %29 = vector.load %arg7[%c0_15, %c0_16] : memref<1x128xf32, #tpu.memory_space<vmem>>, vector<1x128xf32>
    %30 = vector.broadcast %29 : vector<1x128xf32> to vector<16x128xf32>
    %31 = arith.addf %28, %30 : vector<16x128xf32>
    %c0_17 = arith.constant 0 : index
    %c0_18 = arith.constant 0 : index
    %32 = vector.load %arg8[%c0_17, %c0_18] : memref<16x128xf32, #tpu.memory_space<vmem>>, vector<16x128xf32>
    tpu.vector_store %arg8[%c0_17, %c0_18], %31 {strides = array<i32>} : memref<16x128xf32, #tpu.memory_space<vmem>>, vector<16x128xf32>,
    return
  }
  func.func @transform_0(%arg0: i32) -> (i32, i32) {
    %c0_i32 = arith.constant 0 : i32
    %c0_i32_0 = arith.constant 0 : i32
    return %arg0, %c0_i32 : i32, i32
  }
  func.func @transform_1(%arg0: i32) -> (i32, i32) {
    %c0_i32 = arith.constant 0 : i32
    %c0_i32_0 = arith.constant 0 : i32
    %c0_i32_1 = arith.constant 0 : i32
    return %c0_i32, %c0_i32_0 : i32, i32
  }
  func.func @transform_2(%arg0: i32) -> (i32, i32) {
    %c0_i32 = arith.constant 0 : i32
    %c0_i32_0 = arith.constant 0 : i32
    %c0_i32_1 = arith.constant 0 : i32
    return %c0_i32, %c0_i32_0 : i32, i32
  }
  func.func @transform_3(%arg0: i32) -> (i32, i32) {
    %c0_i32 = arith.constant 0 : i32
    %c0_i32_0 = arith.constant 0 : i32
    %c0_i32_1 = arith.constant 0 : i32
    return %c0_i32, %c0_i32_0 : i32, i32
  }
  func.func @transform_4(%arg0: i32) -> (i32, i32) {
    %c0_i32 = arith.constant 0 : i32
    %c0_i32_0 = arith.constant 0 : i32
    %c0_i32_1 = arith.constant 0 : i32
    return %c0_i32, %c0_i32_0 : i32, i32
  }
  func.func @transform_5(%arg0: i32) -> (i32, i32) {
    %c0_i32 = arith.constant 0 : i32
    %c0_i32_0 = arith.constant 0 : i32
    %c0_i32_1 = arith.constant 0 : i32
    return %c0_i32, %c0_i32_0 : i32, i32
  }
  func.func @transform_6(%arg0: i32) -> (i32, i32) {
    %c0_i32 = arith.constant 0 : i32
    %c0_i32_0 = arith.constant 0 : i32
    %c0_i32_1 = arith.constant 0 : i32
    return %c0_i32, %c0_i32_0 : i32, i32
  }
  func.func @transform_7(%arg0: i32) -> (i32, i32) {
    %c0_i32 = arith.constant 0 : i32
    %c0_i32_0 = arith.constant 0 : i32
    return %arg0, %c0_i32 : i32, i32
  }
}

</mosaic_0001>

<bundles_post_ra>
// kernel: tpu_custom_call.1
= control target key start
LH: loop header
LB: loop body
LE: loop exit
PB: predicated region body
PF: predicated region fallthrough
CT: control target
= control target key end

     0   :  { %s1631_s0 = inlined_call_operand.hbm [shape: f32[64,64], index: 0, kind: input, shape index: {}]   ;;  %s1632_s1 = inlined_call_operand.hbm [shape: f32[64,256], index: 1, kind: input, shape index: {}]   ;;  %s1633_s2 = inlined_call_operand.vmem [shape: f32[1,128], index: 2, kind: input, shape index: {}]   ;;  %s1634_s3 = inlined_call_operand.hbm [shape: f32[128,128], index: 3, kind: input, shape index: {}]   ;;  %s1635_s4 = inlined_call_operand.vmem [shape: f32[1,128], index: 4, kind: input, shape index: {}]   ;;  %s1636_s5 = inlined_call_operand.hbm [shape: f32[128,256], index: 5, kind: input, shape index: {}]   ;;  %s1637_s6 = inlined_call_operand.vmem [shape: f32[1,128], index: 6, kind: input, shape index: {}]   ;;  %s1638_s7 = inlined_call_operand.hbm [shape: f32[32,128], index: 7, kind: output, shape index: {}]  }
   0x1   :  { %1645 = sst [smem:[#allocation16_spill]] %s1632_s1 }
   0x2   :  { %12 = vsyncpa [#allocation3], 0 }
   0x3   :  { %14 = vsyncpa [#allocation3 + $0x1], 0 }
   0x4   :  { %15 = vsyncpa [#allocation6], 0 }
   0x5   :  { %16 = vsyncpa [#allocation9], 0 }
   0x6   :  { %17 = vsyncpa [#allocation4], 0 }
   0x7   :  { %19 = vsyncpa [#allocation4 + $0x1], 0  ;;  %s1335_s24 = smov 0   ;;  %s1337_s25 = smov 0  }
   0x8   :  { %s1339_s26 = smov 0   ;;  %s1341_s27 = smov 0  }
   0x9 LB: > { %s1356_s28 = sadd.s32 4294967295, %s1281_s27   ;;  %s842_s29 = sadd.s32 4294967294, %s1281_s27   ;;  %s1281_s27 = sphi %s1341_s27, %s1670_s27   ;;  %s1277_s26 = sphi %s1339_s26, %s1669_s26   ;;  %s1273_s25 = sphi %s1337_s25, %s1668_s25   ;;  %s1269_s24 = sphi %s1335_s24, %s1667_s24  }
   0xa   : > { %p45_p0 = scmp.ne.s32.totalorder %s1273_s25, %s1269_s24  ;;  %p1639_p1 = scmp.eq.s32.totalorder %s1356_s28, 0 }
   0xb   : > { %p201_p3 = scmp.eq.s32.totalorder %s842_s29, 1  ;;  %p843_p5 = scmp.ge.s32.totalorder %s1281_s27, 1 }
   0xc   : > { %p1365_p4 = por %p1639_p1, %p45_p0  ;;  %p208_p7 = scmp.lt.s32.totalorder %s1281_s27, 3 }
   0xd   : > { %p1370_p6 = por %p201_p3, %p45_p0  ;;  %s1283_s10 = smov [#allocation5]  }
   0xe   : > { %s1646_s30 = scalar_select %p1365_p4, 1, 0 }
   0xf   : > { %s1647_s8 = scalar_select %p1370_p6, 1, 0 }
  0x10   : > { %p1375_p8 = pnand %p843_p5, %p208_p7  ;;  %s220_s11 = sshll.u32 %s1283_s10, 4  ;;  %s1379_s11 = int_to_ptr.vmem [resolvable:$true] %s220_s11 }
  0x11   : > { %1648 = sst [smem:[#allocation15_spill]] %s1647_s8  ;;  %s1284_s13 = smov [#allocation7]  }
  0x12   : > { %s1649_s9 = scalar_select %p1375_p8, 1, 0 }
  0x13   : > { %p1025_p9 = pneg %p1375_p8  ;;  %s236_s14 = sshll.u32 %s1284_s13, 4  ;;  %s1390_s14 = int_to_ptr.vmem [resolvable:$true] %s236_s14 }
  0x14   : > { %s1651_s1 = sld [smem:[#allocation16_spill]] }
  0x15   : > { %p1386_p11 = pnand %p1025_p9, %p1639_p1 }
  0x17   : > { %p1400_p13 = pneg %p1386_p11 }
  0x1a   : > { %s1093_s17 = scalar_lea.hbm %s1651_s1, 2048 }
  0x1b   : > { %p1094_p12 = scmp.ne.s32.totalorder %s1651_s1, %s1093_s17  ;;  %p1100_p5 = scmp.lt.u32.totalorder %s1093_s17, %s1651_s1 }
  0x1d   : > { %p1096_p0 = pnand %p1400_p13, %p1094_p12 }
  0x1f   : > { %p1097_p3 = pneg %p1096_p0 }
  0x21   : > { %p1102_p7 = pnand %p1100_p5, %p1097_p3 }
  0x23   : > { %1105 = shalt.err (!%p1102_p7)
}
  0x24   : > { %s1106_s23 = scalar_lea.vmem %s1379_s11, 2048  ;;  %p1114_p2 = scmp.lt.s32.totalorder %s1379_s11, %s1379_s11 }
  0x25   : > { %p1107_p9 = scmp.ne.s32.totalorder %s1379_s11, %s1106_s23  ;;  %p1115_p6 = scmp.lt.s32.totalorder %s1106_s23, %s1106_s23 }
  0x27   : > { %p1109_p10 = pnand %p1107_p9, %p1400_p13  ;;  %p1116_p12 = por %p1115_p6, %p1114_p2 }
  0x29   : > { %p1110_p1 = pneg %p1109_p10 }
  0x2b   : > { %p1117_p0 = pnand %p1116_p12, %p1110_p1 }
  0x2d   : > { %1120 = shalt.err (!%p1117_p0)
}
  0x2e   : > { %s1640_s29 = smov 256   ;;  %s1641_s10 = smov 16  }
  0x2f   : > { %1028 = dma.hbm_to_vmem [thread:$0]  (!%p1386_p11), %s1651_s1, 2048, %s1379_s11, [#allocation6], %s1640_s29, %s1640_s29, %s1641_s10  }
  0x30   : > { %s1121_s18 = scalar_lea.hbm %s1634_s3, 2048 }
  0x31   : > { %p1122_p1 = scmp.ne.s32.totalorder %s1634_s3, %s1121_s18  ;;  %p1128_p10 = scmp.lt.u32.totalorder %s1121_s18, %s1634_s3 }
  0x33   : > { %p1124_p2 = pnand %p1122_p1, %p1400_p13 }
  0x35   : > { %p1125_p6 = pneg %p1124_p2 }
  0x37   : > { %p1130_p3 = pnand %p1128_p10, %p1125_p6 }
  0x39   : > { %1133 = shalt.err (!%p1130_p3)
}
  0x3a   : > { %s1134_s11 = scalar_lea.vmem %s1390_s14, 2048  ;;  %p1142_p12 = scmp.lt.s32.totalorder %s1390_s14, %s1390_s14 }
  0x3b   : > { %p1135_p5 = scmp.ne.s32.totalorder %s1390_s14, %s1134_s11  ;;  %p1143_p0 = scmp.lt.s32.totalorder %s1134_s11, %s1134_s11 }
  0x3d   : > { %p1137_p7 = pnand %p1135_p5, %p1400_p13  ;;  %p1144_p1 = por %p1143_p0, %p1142_p12 }
  0x3f   : > { %p1138_p9 = pneg %p1137_p7 }
  0x41   : > { %p1145_p2 = pnand %p1144_p1, %p1138_p9 }
  0x43   : > { %1148 = shalt.err (!%p1145_p2)
}
  0x44   : > { %s1287_s13 = smov 128   ;;  %s1288_s15 = smov 8  }
  0x45   : > { %1031 = dma.hbm_to_vmem [thread:$0]  (!%p1386_p11), %s1634_s3, 2048, %s1390_s14, [#allocation6], %s1287_s13, %s1287_s13, %s1288_s15  }
  0x46   : > { %s1289_s18 = smov [#allocation8]   ;;  %s1451_s21 = sadd.s32 1, %s1281_s27  }
  0x47   : > { %s252_s19 = sshll.u32 %s1289_s18, 4  ;;  %s1149_s11 = scalar_lea.hbm %s1636_s5, 4096  ;;  %s253_s19 = int_to_ptr.vmem [resolvable:$true] %s252_s19 }
  0x48   : > { %p1150_p6 = scmp.ne.s32.totalorder %s1636_s5, %s1149_s11  ;;  %p1156_p5 = scmp.lt.u32.totalorder %s1149_s11, %s1636_s5 }
  0x4a   : > { %p1152_p10 = pnand %p1150_p6, %p1400_p13 }
  0x4c   : > { %p1153_p3 = pneg %p1152_p10 }
  0x4e   : > { %p1158_p7 = pnand %p1156_p5, %p1153_p3 }
  0x50   : > { %1161 = shalt.err (!%p1158_p7)
}
  0x51   : > { %s1162_s14 = scalar_lea.vmem %s253_s19, 4096  ;;  %p1170_p1 = scmp.lt.s32.totalorder %s253_s19, %s253_s19 }
  0x52   : > { %p1163_p9 = scmp.ne.s32.totalorder %s253_s19, %s1162_s14  ;;  %p1171_p2 = scmp.lt.s32.totalorder %s1162_s14, %s1162_s14 }
  0x54   : > { %p1165_p12 = pnand %p1163_p9, %p1400_p13  ;;  %p1172_p4 = por %p1171_p2, %p1170_p1 }
  0x56   : > { %p1166_p0 = pneg %p1165_p12 }
  0x58   : > { %p1173_p8 = pnand %p1172_p4, %p1166_p0 }
  0x5a   : > { %1176 = shalt.err (!%p1173_p8)
}
  0x5b   : > { %s1653_s29 = smov 16   ;;  %s1654_s10 = smov 256  }
  0x5c   : > { %1034 = dma.hbm_to_vmem [thread:$0]  (!%p1386_p11), %s1636_s5, 4096, %s253_s19, [#allocation9], %s1654_s10, %s1654_s10, %s1653_s29  }
  0x5d   : > { %s29_s20 = ssub.s32 %s1281_s27, %s1451_s21  ;;  %s32_s12 = sadd.s32 1, %s1277_s26 }
  0x5e   : > { %p30_p4 = scmp.eq.s32.totalorder %s29_s20, 0  ;;  %p39_p8 = scmp.ne.s32.totalorder %s1277_s26, %s1273_s25 }
  0x5f   : > { %p40_p13 = scmp.eq.s32.totalorder %s1281_s27, 0  ;;  %p1046_p6 = scmp.lt.s32.totalorder %s1281_s27, 2 }
  0x60   : > { %s1482_s16 = scalar_select %p30_p4, %s1277_s26, %s32_s12  }
  0x61   : > { %p41_p10 = por %p40_p13, %p39_p8  ;;  %p1655_p3 = scmp.eq.s32.totalorder %s1356_s28, 1 }
  0x62   : > { %s269_s18 = sand.u32 1, %s1277_s26   ;;  %s869_s22 = sshll.u32 %s1281_s27, 9 }
  0x63   : > { %p1486_p5 = por %p1655_p3, %p39_p8  ;;  %s848_s23 = sshll.u32 %s269_s18, 5 }
  0x64   : > { %s1495_s19 = scalar_lea.hbm %s1631_s0, %s869_s22  ;;  %s273_s29 = scalar_lea.vmem [#allocation2], %s848_s23 }
  0x65   : > { %s280_s10 = sshll.u32 %s273_s29, 4  ;;  %p1497_p11 = pnand %p1046_p6, %p41_p10  ;;  %s1501_s10 = int_to_ptr.vmem [resolvable:$true] %s280_s10 }
  0x66   : > { %s1503_s8 = scalar_lea.sflag [#allocation3], %s269_s18  ;;  %s1177_s20 = scalar_lea.hbm %s1495_s19, 512 }
  0x67   : > { %p1178_p7 = scmp.ne.s32.totalorder %s1495_s19, %s1177_s20  ;;  %p1179_p9 = pneg %p1497_p11 }
  0x68   : > { %s1182_s23 = scalar_lea.hbm %s1631_s0, 1024  ;;  %p1183_p1 = scmp.lt.u32.totalorder %s1495_s19, %s1631_s0 }
  0x69   : > { %p1180_p12 = pnand %p1179_p9, %p1178_p7  ;;  %p1184_p2 = scmp.lt.u32.totalorder %s1182_s23, %s1177_s20 }
  0x6a   : > { %p1186_p8 = scmp.lt.u32.totalorder %s1177_s20, %s1495_s19 }
  0x6b   : > { %p1181_p0 = pneg %p1180_p12  ;;  %p1185_p4 = por %p1184_p2, %p1183_p1 }
  0x6d   : > { %p1187_p13 = por %p1186_p8, %p1185_p4 }
  0x6f   : > { %p1188_p6 = pnand %p1187_p13, %p1181_p0 }
  0x71   : > { %1191 = shalt.err (!%p1188_p6)
}
  0x72   : > { %s1192_s18 = scalar_lea.vmem %s1501_s10, 512  ;;  %s1290_s29 = smov [#allocation2]  }
  0x73   : > { %p1193_p10 = scmp.ne.s32.totalorder %s1501_s10, %s1192_s18  ;;  %s1197_s12 = sshll.u32 %s1290_s29, 4  ;;  %s1198_s12 = int_to_ptr.vmem [resolvable:$false] %s1197_s12 }
  0x74   : > { %s1199_s22 = scalar_lea.vmem %s1198_s12, 1024  ;;  %p1200_p12 = scmp.lt.s32.totalorder %s1501_s10, %s1198_s12 }
  0x75   : > { %p1195_p3 = pnand %p1193_p10, %p1179_p9  ;;  %p1201_p1 = scmp.lt.s32.totalorder %s1199_s22, %s1192_s18 }
  0x77   : > { %p1196_p7 = pneg %p1195_p3  ;;  %p1202_p2 = por %p1201_p1, %p1200_p12 }
  0x79   : > { %p1203_p4 = pnand %p1202_p2, %p1196_p7 }
  0x7b   : > { %1206 = shalt.err (!%p1203_p4)
}
  0x7c   : > { %1038 = dma.hbm_to_vmem [thread:$0]  (!%p1497_p11), %s1495_s19, 512, %s1501_s10, %s1503_s8, %s1287_s13, %s1287_s13, %s1288_s15  }
  0x7d   : > { %p1658_p9 = scmp.ne.s32.totalorder %s1649_s9, 0 }
  0x7e   : > { %s1537_s20 = sand.u32 (!%p1658_p9), 1, %s1273_s25   ;;  %p1659_p0 = scmp.ne.s32.totalorder (!%p1658_p9), %s1646_s30, 0 }
  0x7f   : > { %292 = sbr.rel (%p1658_p9) target bundleno = 853 (0x355), region = 48  ;;  %s852_s23 = sshll.u32 (!%p1658_p9), %s1537_s20, 5 }
  0x80   : > { %s295_s11 = scalar_lea.sflag (!%p1658_p9), [#allocation3], %s1537_s20  ;;  %s1541_s14 = scalar_lea.vmem (!%p1658_p9), [#allocation2], %s852_s23 }
  0x86   : > { %1252 = dma.done.wait (%p1659_p0), %s295_s11, 512  }
  0x87   : > { %1254 = vsyncadd (%p1659_p0), %s295_s11, 4294966784  ;;  %p1660_p11 = scmp.eq.s32.totalorder %s1356_s28, 0 }
  0x89   : > { %1256 = dma.done.wait (%p1660_p11), [#allocation6], 4096   ;;  %p1661_p8 = pmov %p1660_p11 }
  0x8b   : > { %1258 = vsyncadd (%p1661_p8), [#allocation6], 4294963200  ;;  %p1662_p13 = pmov %p1661_p8 }
  0x8c   : > { %p1663_p6 = pmov %p1661_p8 }
  0x8d   : > { %1260 = dma.done.wait (%p1662_p13), [#allocation9], 4096  }
  0x8e   : > { %1262 = vsyncadd (%p1663_p6), [#allocation9], 4294963200  ;;  %v1291_v0 = vmov 0.0   ;;  %v348_v1 = vld [vmem:[#allocation5 + $0x8] sm:$0xff]  ;;  %v350_v2 = vld [vmem:[#allocation5 + $0x18] sm:$0xff]  ;;  %vm363_vm0 = vcmask 523264  }
  0x8f   : > { %440 = vmatprep.mubr.f32.mxu1 %v1291_v0  ;;  %692 = vmatprep.mubr.f32.mxu0 %v1291_v0  ;;  %v347_v3 = vld [vmem:[#allocation5] sm:$0xff]  ;;  %v929_v4 = vpack.c.bf16 %v350_v2, %v348_v1  ;;  %v349_v5 = vld [vmem:[#allocation5 + $0x10] sm:$0xff]  ;;  %v352_v6 = vld [vmem:[#allocation5 + $0x28] sm:$0xff]  ;;  %s856_s19 = sshll.u32 %s1537_s20, 4  ;;  %s870_s29 = sshll.u32 %s1356_s28, 8 }
  0x90   : > { %v354_v7 = vld [vmem:[#allocation5 + $0x38] sm:$0xff]  ;;  %v931_v8 = vpack.c.bf16 %v349_v5, %v347_v3  ;;  %v351_v10 = vld [vmem:[#allocation5 + $0x20] sm:$0xff]  ;;  %v353_v11 = vld [vmem:[#allocation5 + $0x30] sm:$0xff]  ;;  %s340_s8 = scalar_lea.vmem [#allocation10], %s856_s19  ;;  %s1587_s23 = scalar_lea.hbm %s1638_s7, %s870_s29 }
  0x91   : > { %v933_v9 = vpack.c.bf16 %v354_v7, %v352_v6  ;;  %v356_v12 = vld [vmem:[#allocation5 + $0x48] sm:$0xff]  ;;  %930 = vmatprep.subr.bf16.mxu1 %v929_v4  ;;  %v358_v13 = vld [vmem:[#allocation5 + $0x58] sm:$0xff]  ;;  %v935_v14 = vpack.c.bf16 %v353_v11, %v351_v10  ;;  %v355_v16 = vld [vmem:[#allocation5 + $0x40] sm:$0xff]  ;;  %s740_s18 = sshll.u32 %s340_s8, 4  ;;  %s727_s11 = scalar_lea.sflag [#allocation4], %s1537_s20  ;;  %s1582_s18 = int_to_ptr.vmem [resolvable:$true] %s740_s18 }
  0x92   : > { %932 = vmatpush1.bf16.msra.mxu1 %v931_v8  ;;  %v937_v15 = vpack.c.bf16 %v358_v13, %v356_v12  ;;  %v357_v17 = vld [vmem:[#allocation5 + $0x50] sm:$0xff]  ;;  %v360_v18 = vld [vmem:[#allocation5 + $0x68] sm:$0xff]  ;;  %v362_v19 = vld [vmem:[#allocation5 + $0x78] sm:$0xff]  ;;  %s1292_s28 = smov [#allocation10]  }
  0x93   : > { %934 = vmatprep.subr.bf16.mxu1 %v933_v9  ;;  %v939_v20 = vpack.c.bf16 %v357_v17, %v355_v16  ;;  %v941_v21 = vpack.c.bf16 %v362_v19, %v360_v18  ;;  %v359_v22 = vld [vmem:[#allocation5 + $0x60] sm:$0xff]  ;;  %v361_v23 = vld [vmem:[#allocation5 + $0x70] sm:$0xff]  ;;  %v485_v25 = vld [vmem:[#allocation7 + $0x8] sm:$0xff]  ;;  %s1211_s30 = sshll.u32 %s1292_s28, 4  ;;  %s1212_s30 = int_to_ptr.vmem [resolvable:$false] %s1211_s30 }
  0x94   : > { %v484_v24 = vld [vmem:[#allocation7] sm:$0xff]  ;;  %v943_v26 = vpack.c.bf16 %v361_v23, %v359_v22  ;;  %v486_v28 = vld [vmem:[#allocation7 + $0x10] sm:$0xff]  ;;  %v487_v29 = vld [vmem:[#allocation7 + $0x18] sm:$0xff]  ;;  %s1213_s9 = scalar_lea.vmem %s1212_s30, 512  ;;  %p1214_p12 = scmp.lt.s32.totalorder %s1582_s18, %s1212_s30 }
  0x95   : > { %v945_v27 = vpack.c.bf16 %v485_v25, %v484_v24  ;;  %v343_v30 = vld [vmem:[%s1541_s14] sm:$0xff]  ;;  %v949_v31 = vpack.c.bf16 %v487_v29, %v486_v28  ;;  %v489_v33 = vld [vmem:[#allocation7 + $0x28] sm:$0xff]  ;;  %v345_v36 = vld [vmem:[%s1541_s14 + $0x10] sm:$0xff] }
  0x96   : > { %936 = vmatpush1.bf16.msra.mxu1 %v935_v14  ;;  %v488_v32 = vld [vmem:[#allocation7 + $0x20] sm:$0xff]  ;;  %v344_v34 = vld [vmem:[%s1541_s14 + $0x8] sm:$0xff]  ;;  %v346_v37 = vld [vmem:[%s1541_s14 + $0x18] sm:$0xff]  ;;  %s1207_s14 = scalar_lea.vmem %s1582_s18, 256 }
  0x97   : > { %938 = vmatprep.subr.bf16.mxu1 %v937_v15  ;;  %v953_v35 = vpack.c.bf16 %v489_v33, %v488_v32  ;;  %v490_v38 = vld [vmem:[#allocation7 + $0x30] sm:$0xff]  ;;  %v491_v39 = vld [vmem:[#allocation7 + $0x38] sm:$0xff]  ;;  %v492_v41 = vld [vmem:[#allocation7 + $0x40] sm:$0xff]  ;;  %p1208_p10 = scmp.ne.s32.totalorder %s1582_s18, %s1207_s14  ;;  %p1215_p1 = scmp.lt.s32.totalorder %s1213_s9, %s1207_s14 }
  0x98   : > { %v957_v40 = vpack.c.bf16 %v491_v39, %v490_v38  ;;  %v493_v42 = vld [vmem:[#allocation7 + $0x48] sm:$0xff]  ;;  %v494_v44 = vld [vmem:[#allocation7 + $0x50] sm:$0xff]  ;;  %v495_v45 = vld [vmem:[#allocation7 + $0x58] sm:$0xff] }
  0x99   : > { %v961_v43 = vpack.c.bf16 %v493_v42, %v492_v41  ;;  %v965_v46 = vpack.c.bf16 %v495_v45, %v494_v44  ;;  %v496_v47 = vld [vmem:[#allocation7 + $0x60] sm:$0xff]  ;;  %v497_v48 = vld [vmem:[#allocation7 + $0x68] sm:$0xff]  ;;  %v498_v50 = vld [vmem:[#allocation7 + $0x70] sm:$0xff]  ;;  %p1209_p3 = pnand %p1208_p10, %p1486_p5  ;;  %p1216_p2 = por %p1215_p1, %p1214_p12 }
  0x9a   : > { %940 = vmatpush1.bf16.msra.mxu1 %v939_v20  ;;  %v969_v49 = vpack.c.bf16 %v497_v48, %v496_v47  ;;  %v499_v51 = vld [vmem:[#allocation7 + $0x78] sm:$0xff]  ;;  %v597_v53 = vld [vmem:[#allocation8 + $0x8] sm:$0xff]  ;;  %v596_v55 = vld [vmem:[#allocation8] sm:$0xff] }
  0x9b   : > { %942 = vmatprep.subr.bf16.mxu1 %v941_v21  ;;  %v973_v52 = vpack.c.bf16 %v499_v51, %v498_v50  ;;  %v599_v54 = vld [vmem:[#allocation8 + $0x18] sm:$0xff]  ;;  %v598_v57 = vld [vmem:[#allocation8 + $0x10] sm:$0xff]  ;;  %v601_v58 = vld [vmem:[#allocation8 + $0x28] sm:$0xff]  ;;  %p1210_p7 = pneg %p1209_p3 }
  0x9c   : > { %v977_v56 = vpack.c.bf16 %v599_v54, %v597_v53  ;;  %v603_v59 = vld [vmem:[#allocation8 + $0x38] sm:$0xff]  ;;  %v979_v60 = vpack.c.bf16 %v598_v57, %v596_v55  ;;  %v600_v62 = vld [vmem:[#allocation8 + $0x20] sm:$0xff]  ;;  %v602_v63 = vld [vmem:[#allocation8 + $0x30] sm:$0xff] }
  0x9d   : > { %v981_v61 = vpack.c.bf16 %v603_v59, %v601_v58  ;;  %v605_v1 = vld [vmem:[#allocation8 + $0x48] sm:$0xff]  ;;  %v607_v2 = vld [vmem:[#allocation8 + $0x58] sm:$0xff]  ;;  %v983_v3 = vpack.c.bf16 %v602_v63, %v600_v62  ;;  %v604_v5 = vld [vmem:[#allocation8 + $0x40] sm:$0xff]  ;;  %p1217_p4 = pnand %p1216_p2, %p1210_p7 }
  0x9e   : > { %944 = vmatpush1.bf16.msra.mxu1 %v943_v26  ;;  %978 = vmatprep.subr.bf16.mxu0 %v977_v56  ;;  %v985_v4 = vpack.c.bf16 %v607_v2, %v605_v1  ;;  %v606_v6 = vld [vmem:[#allocation8 + $0x50] sm:$0xff]  ;;  %v609_v7 = vld [vmem:[#allocation8 + $0x68] sm:$0xff]  ;;  %v611_v8 = vld [vmem:[#allocation8 + $0x78] sm:$0xff] }
  0x9f   : > { %946 = vmatprep.subr.bf16.mxu1 %v945_v27  ;;  %980 = vmatpush1.bf16.msra.mxu0 %v979_v60  ;;  %v987_v9 = vpack.c.bf16 %v606_v6, %v604_v5  ;;  %v989_v10 = vpack.c.bf16 %v611_v8, %v609_v7  ;;  %v608_v11 = vld [vmem:[#allocation8 + $0x60] sm:$0xff]  ;;  %v610_v12 = vld [vmem:[#allocation8 + $0x70] sm:$0xff]  ;;  %v613_v13 = vld [vmem:[#allocation8 + $0x88] sm:$0xff] }
  0xa0   : > { %982 = vmatprep.subr.bf16.mxu0 %v981_v61  ;;  %v615_v14 = vld [vmem:[#allocation8 + $0x98] sm:$0xff]  ;;  %v991_v15 = vpack.c.bf16 %v610_v12, %v608_v11  ;;  %v612_v17 = vld [vmem:[#allocation8 + $0x80] sm:$0xff]  ;;  %v614_v18 = vld [vmem:[#allocation8 + $0x90] sm:$0xff] }
  0xa1   : > { %857 = vmatmul.mubr.msk.f32.vlgmr.msra.gmra.mrb[0].mxu1 %vm363_vm0, %v343_v30  ;;  %v993_v16 = vpack.c.bf16 %v615_v14, %v613_v13  ;;  %v617_v19 = vld [vmem:[#allocation8 + $0xa8] sm:$0xff]  ;;  %v619_v20 = vld [vmem:[#allocation8 + $0xb8] sm:$0xff]  ;;  %v995_v21 = vpack.c.bf16 %v614_v18, %v612_v17  ;;  %v616_v23 = vld [vmem:[#allocation8 + $0xa0] sm:$0xff] }
  0xa2   : > { %446 = vmatprep.mubr.f32.mxu1 %v1291_v0  ;;  %948 = vmatpush3.bf16.msra.mxu1 %v945_v27  ;;  %v997_v22 = vpack.c.bf16 %v619_v20, %v617_v19  ;;  %v618_v24 = vld [vmem:[#allocation8 + $0xb0] sm:$0xff]  ;;  %v621_v25 = vld [vmem:[#allocation8 + $0xc8] sm:$0xff]  ;;  %v623_v26 = vld [vmem:[#allocation8 + $0xd8] sm:$0xff] }
  0xa3   : > { %950 = vmatprep.subr.bf16.mxu1 %v949_v31  ;;  %984 = vmatpush1.bf16.msra.mxu0 %v983_v3  ;;  %v999_v27 = vpack.c.bf16 %v618_v24, %v616_v23  ;;  %v1001_v28 = vpack.c.bf16 %v623_v26, %v621_v25  ;;  %v620_v29 = vld [vmem:[#allocation8 + $0xc0] sm:$0xff]  ;;  %v622_v30 = vld [vmem:[#allocation8 + $0xd0] sm:$0xff]  ;;  %v625_v53 = vld [vmem:[#allocation8 + $0xe8] sm:$0xff] }
  0xa4   : > { %986 = vmatprep.subr.bf16.mxu0 %v985_v4  ;;  %v861_v38 = vld [vmem:[%s1633_s2] ss:$0 sm:$0xff]  ;;  %v627_v54 = vld [vmem:[#allocation8 + $0xf8] sm:$0xff]  ;;  %v626_v57 = vld [vmem:[#allocation8 + $0xf0] sm:$0xff] }
  0xa5   : > { %858 = vmatmul.mubr.msk.f32.gmra.mrb[2].mxu1 %vm363_vm0, %v344_v34  ;;  %v1005_v55 = vpack.c.bf16 %v627_v54, %v625_v53  ;;  %v624_v56 = vld [vmem:[#allocation8 + $0xe0] sm:$0xff] }
  0xa6   : > { %452 = vmatprep.mubr.f32.mxu1 %v1291_v0  ;;  %952 = vmatpush3.bf16.msra.mxu1 %v949_v31  ;;  %v1003_v31 = vpack.c.bf16 %v622_v30, %v620_v29  ;;  %v1007_v58 = vpack.c.bf16 %v626_v57, %v624_v56  ;;  %v862_v59 = vld [vmem:[%s1635_s4] ss:$0 sm:$0xff] }
  0xa7   : > { %954 = vmatprep.subr.bf16.mxu1 %v953_v35  ;;  %988 = vmatpush1.bf16.msra.mxu0 %v987_v9 }
  0xa8   : > { %990 = vmatprep.subr.bf16.mxu0 %v989_v10 }
  0xa9   : > { %859 = vmatmul.mubr.msk.f32.gmra.mrb[4].mxu1 %vm363_vm0, %v345_v36 }
  0xaa   : > { %458 = vmatprep.mubr.f32.mxu1 %v1291_v0  ;;  %956 = vmatpush3.bf16.msra.mxu1 %v953_v35 }
  0xab   : > { %958 = vmatprep.subr.bf16.mxu1 %v957_v40  ;;  %992 = vmatpush1.bf16.msra.mxu0 %v991_v15  ;;  %v863_v15 = vld [vmem:[%s1637_s6] ss:$0 sm:$0xff] }
  0xac   : > { %994 = vmatprep.subr.bf16.mxu0 %v993_v16 }
  0xad   : > { %860 = vmatmul.mubr.msk.f32.gmra.mrb[6].mxu1 %vm363_vm0, %v346_v37 }
  0xae   : > { %960 = vmatpush3.bf16.msra.mxu1 %v957_v40 }
  0xaf   : > { %962 = vmatprep.subr.bf16.mxu1 %v961_v43  ;;  %996 = vmatpush1.bf16.msra.mxu0 %v995_v21 }
  0xb0   : > { %998 = vmatprep.subr.bf16.mxu0 %v997_v22 }
  0xb2   : > { %964 = vmatpush3.bf16.msra.mxu1 %v961_v43 }
  0xb3   : > { %966 = vmatprep.subr.bf16.mxu1 %v965_v46  ;;  %1000 = vmatpush1.bf16.msra.mxu0 %v999_v27 }
  0xb4   : > { %1002 = vmatprep.subr.bf16.mxu0 %v1001_v28 }
  0xb6   : > { %968 = vmatpush3.bf16.msra.mxu1 %v965_v46 }
  0xb7   : > { %970 = vmatprep.subr.bf16.mxu1 %v969_v49  ;;  %1004 = vmatpush1.bf16.msra.mxu0 %v1003_v31 }
  0xb8   : > { %1006 = vmatprep.subr.bf16.mxu0 %v1005_v55 }
  0xba   : > { %972 = vmatpush3.bf16.msra.mxu1 %v969_v49 }
  0xbb   : > { %974 = vmatprep.subr.bf16.mxu1 %v973_v52  ;;  %1008 = vmatpush1.bf16.msra.mxu0 %v1007_v58 }
  0xbe   : > { %976 = vmatpush3.bf16.msra.mxu1 %v973_v52 }
 0x174   : > { %v442_v32 = vpop.f32.mrb[0].mxu1 }
 0x175   : > { %v444_v33 = vpop.f32.mrb[1].mxu1 }
 0x178   : > { %v448_v34 = vpop.f32.mrb[2].mxu1 }
 0x179   : > { %v450_v35 = vpop.f32.mrb[3].mxu1 }
 0x17c   : > { %v454_v36 = vpop.f32.mrb[4].mxu1 }
 0x17d   : > { %v467_v37 = vadd.f32 %v454_v36, %v444_v33  ;;  %v456_v39 = vpop.f32.mrb[5].mxu1 }
 0x17e   : > { %v465_v40 = vadd.f32 %v456_v39, %v442_v32 }
 0x17f   : > { %v478_v47 = vadd.f32 %v861_v38, %v467_v37 }
 0x180   : > { %v476_v41 = vadd.f32 %v861_v38, %v465_v40  ;;  %v460_v42 = vpop.f32.mrb[6].mxu1 }
 0x181   : > { %v468_v43 = vadd.f32 %v460_v42, %v450_v35  ;;  %v462_v44 = vpop.f32.mrb[7].mxu1  ;;  %v482_v51 = vmax.f32 %v478_v47, 0.0 }
 0x182   : > { %v480_v45 = vmax.f32 %v476_v41, 0.0  ;;  %v466_v46 = vadd.f32 %v462_v44, %v448_v34 }
 0x183   : > { %v479_v49 = vadd.f32 %v861_v38, %v468_v43 }
 0x184   : > { %v477_v48 = vadd.f32 %v861_v38, %v466_v46  ;;  %923 = vmatprep.mubr.f32.mxu1 %v480_v45 }
 0x185   : > { %v483_v52 = vmax.f32 %v479_v49, 0.0 }
 0x186   : > { %v481_v50 = vmax.f32 %v477_v48, 0.0 }
 0x188   : > { %924 = vmatmul.mubr.f32.vlgmr.msra.gmra.mrb[8].mxu1 %v481_v50 }
 0x189   : > { %926 = vmatprep.mubr.f32.mxu1 %v482_v51 }
 0x18c   : > { %927 = vmatmul.mubr.f32.gmra.mrb[10].mxu1 %v483_v52 }
 0x25b   : > { %v925_v60 = vpop.f32.mrb[8].mxu1 }
 0x25c   : > { %v573_v61 = vpop.f32.mrb[9].mxu1  ;;  %v579_v63 = vadd.f32 %v925_v60, %v862_v59 }
 0x25d   : > { %v574_v62 = vadd.f32 %v862_v59, %v573_v61 }
 0x25e   : > { %v593_v4 = vmax.f32 %v579_v63, 0.0 }
 0x25f   : > { %v592_v1 = vmax.f32 %v574_v62, 0.0  ;;  %v928_v2 = vpop.f32.mrb[10].mxu1 }
 0x260   : > { %v583_v3 = vpop.f32.mrb[11].mxu1  ;;  %v589_v6 = vadd.f32 %v928_v2, %v862_v59 }
 0x261   : > { %693 = vmatmul.mubr.f32.vlgmr.msra.gmra.mrb[0].mxu0 %v592_v1  ;;  %v584_v5 = vadd.f32 %v862_v59, %v583_v3 }
 0x262   : > { %697 = vmatprep.mubr.f32.mxu0 %v1291_v0  ;;  %v595_v8 = vmax.f32 %v589_v6, 0.0 }
 0x263   : > { %v594_v7 = vmax.f32 %v584_v5, 0.0 }
 0x265   : > { %698 = vmatmul.mubr.f32.gmra.mrb[2].mxu0 %v593_v4 }
 0x266   : > { %702 = vmatprep.mubr.f32.mxu0 %v1291_v0 }
 0x269   : > { %703 = vmatmul.mubr.f32.gmra.mrb[4].mxu0 %v594_v7 }
 0x26a   : > { %707 = vmatprep.mubr.f32.mxu0 %v1291_v0 }
 0x26d   : > { %708 = vmatmul.mubr.f32.gmra.mrb[6].mxu0 %v595_v8 }
 0x334   : > { %v694_v9 = vpop.f32.mrb[0].mxu0 }
 0x335   : > { %v696_v10 = vpop.f32.mrb[1].mxu0 }
 0x338   : > { %v699_v11 = vpop.f32.mrb[2].mxu0 }
 0x339   : > { %v701_v12 = vpop.f32.mrb[3].mxu0 }
 0x33c   : > { %v704_v13 = vpop.f32.mrb[4].mxu0 }
 0x33d   : > { %v705_v14 = vpop.f32.mrb[5].mxu0 }
 0x33e   : > { %v713_v16 = vadd.f32 %v705_v14, %v694_v9 }
 0x340   : > { %v722_v0 = vadd.f32 %v863_v15, %v713_v16  ;;  %v709_v17 = vpop.f32.mrb[6].mxu0 }
 0x341   : > { %v710_v18 = vpop.f32.mrb[7].mxu0 }
 0x342   : > { %724 = vst [vmem:[%s340_s8] sm:$0xff] %v722_v0  ;;  %v714_v19 = vadd.f32 %v710_v18, %v699_v11 }
 0x344   : > { %v723_v20 = vadd.f32 %v863_v15, %v714_v19 }
 0x346   : > { %725 = vst [vmem:[%s340_s8 + $0x8] sm:$0xff] %v723_v20 }
 0x347   : > { %1220 = shalt.err (!%p1217_p4)
}
 0x348   : > { %s1221_s13 = scalar_lea.hbm %s1587_s23, 256  ;;  %s1225_s10 = scalar_lea.hbm %s1638_s7, 512 }
 0x349   : > { %p1222_p9 = scmp.ne.s32.totalorder %s1587_s23, %s1221_s13  ;;  %p1226_p8 = scmp.lt.u32.totalorder %s1587_s23, %s1638_s7 }
 0x34a   : > { %p1227_p13 = scmp.lt.u32.totalorder %s1225_s10, %s1221_s13  ;;  %p1229_p10 = scmp.lt.u32.totalorder %s1221_s13, %s1587_s23 }
 0x34b   : > { %p1223_p0 = pnand %p1222_p9, %p1486_p5 }
 0x34c   : > { %p1228_p6 = por %p1227_p13, %p1226_p8 }
 0x34d   : > { %p1224_p11 = pneg %p1223_p0 }
 0x34e   : > { %p1230_p3 = por %p1229_p10, %p1228_p6 }
 0x350   : > { %p1231_p7 = pnand %p1230_p3, %p1224_p11 }
 0x352   : > { %1234 = shalt.err (!%p1231_p7)
}
 0x353   : > { %s1293_s29 = smov 128   ;;  %s1294_s12 = smov 8  }
 0x354   : > { %1023 = dma.vmem_to_hbm [thread:$0]  (%p1486_p5), %s1582_s18, 256, %s1587_s23, %s727_s11, %s1293_s29, %s1293_s29, %s1294_s12  }
 0x355 PF: > { %s1664_s22 = sld [smem:[#allocation15_spill]]  ;;  %s755_s14 = sand.u32 1, %s1269_s24  }
 0x356   : > { %p1666_p1 = scmp.ge.s32.totalorder %s1281_s27, 2  ;;  %s756_s28 = scalar_lea.sflag [#allocation4], %s755_s14 }
 0x35b   : > { %p1665_p12 = scmp.ne.s32.totalorder %s1664_s22, 0 }
 0x35d   : > { %p1040_p2 = pnand %p1666_p1, %p1665_p12 }
 0x35f   : > { %1264 = dma.done.wait (!%p1040_p2), %s756_s28, 256  }
 0x360   : > { %1266 = vsyncadd (!%p1040_p2), %s756_s28, 4294967040  ;;  %p22_p4 = scmp.ge.s32.totalorder %s1451_s21, 4   ;;  %s1667_s24 = smov %s1273_s25 }
 0x361   : > { %s1668_s25 = smov %s1277_s26  ;;  %s1669_s26 = smov %s1482_s16 }
 0x362   : > { %s1670_s27 = smov %s1451_s21  ;;  %24 = sbr.rel (!%p22_p4) target bundleno = 9 (0x9), region = 105 }
 0x369   :  { %761 = vsyncpa [#allocation3], 1 }
 0x36a   :  { %763 = vsyncpa [#allocation3 + $0x1], 1 }
 0x36b   :  { %764 = vsyncpa [#allocation6], 1 }
 0x36c   :  { %765 = vsyncpa [#allocation9], 1 }
 0x36d   :  { %766 = vsyncpa [#allocation4], 1 }
 0x36e   :  { %768 = vsyncpa [#allocation4 + $0x1], 1 }

</bundles_post_ra>
